<compile_context>
chip_gen: v7x
topology: tpu7x:2x2x1
jax: 0.10.0
libtpu: 0.0.40
codegen_flags: <defaults>
</compile_context>

<pallas_src>
import jax
import jax.numpy as jnp
from jax.experimental import pallas as pl
from jax.experimental.pallas import tpu as pltpu

_LANES = 128
_SUBLANES = 8
_MAX_TILE_ROWS = 512  # 512x128 f32 = 256 KiB / buffer: fits scoped VMEM on v5e/v6e/v7x


def _make_sum_exp_kernel(tile_rows, total_rows, mask_tail):
    """Pass 1: accumulate sum(exp(x)) over all tiles into a (1,1) f32 output."""

    def kernel(x_ref, sum_ref):
        i = pl.program_id(0)

        @pl.when(i == 0)
        def _init():
            sum_ref[...] = jnp.zeros_like(sum_ref)

        xv = x_ref[...].astype(jnp.float32)
        if mask_tail:
            # Last tile may read past the real rows; force exp -> 0 there.
            row = jax.lax.broadcasted_iota(jnp.int32, xv.shape, 0) + i * tile_rows
            xv = jnp.where(row < total_rows, xv, -jnp.inf)
        sum_ref[...] = sum_ref[...] + jnp.sum(jnp.exp(xv))

    return kernel


def _normalize_kernel(sum_ref, x_ref, o_ref):
    """Pass 2: out = exp(x) * (1 / total).  Recomputes exp (EUP is free)."""
    inv = 1.0 / sum_ref[0, 0]          # one exact scalar reciprocal per tile
    e = jnp.exp(x_ref[...].astype(jnp.float32))
    o_ref[...] = (e * inv).astype(o_ref.dtype)


def global_softmax(x):
    """exp(x) / sum(exp(x)) over ALL elements, same shape/dtype as x."""
    orig_shape = x.shape
    orig_dtype = x.dtype
    n = x.size
    itemsize = jnp.dtype(orig_dtype).itemsize

    # Flatten to a lane-dense [rows, 128] slab, padding (with -inf => exp=0)
    # only when the flat size is not already (8,128)-tile aligned.
    align = _SUBLANES * _LANES
    n_pad = ((n + align - 1) // align) * align
    flat = x.reshape(-1)
    if n_pad != n:
        flat = jnp.pad(flat, (0, n_pad - n), constant_values=-jnp.inf)
    rows = n_pad // _LANES
    slab = flat.reshape(rows, _LANES)

    tile_rows = min(_MAX_TILE_ROWS, rows)      # rows is a multiple of 8
    num_tiles = pl.cdiv(rows, tile_rows)
    mask_tail = (rows % tile_rows) != 0        # ragged last tile -> mask in kernel

    # ---- Pass 1: global sum of exp(x) (reduction, resident accumulator) ----
    total = pl.pallas_call(
        _make_sum_exp_kernel(tile_rows, rows, mask_tail),
        out_shape=jax.ShapeDtypeStruct((1, 1), jnp.float32),
        grid=(num_tiles,),
        in_specs=[pl.BlockSpec((tile_rows, _LANES), lambda i: (i, 0))],
        out_specs=pl.BlockSpec((1, 1), lambda i: (0, 0)),
        compiler_params=pltpu.CompilerParams(
            dimension_semantics=("arbitrary",)),
        cost_estimate=pl.CostEstimate(
            flops=n_pad,
            transcendentals=n_pad,
            bytes_accessed=n_pad * itemsize + 4),
    )(slab)

    # ---- Pass 2: normalize by the reciprocal of the total ------------------
    out_slab = pl.pallas_call(
        _normalize_kernel,
        out_shape=jax.ShapeDtypeStruct((rows, _LANES), orig_dtype),
        grid=(num_tiles,),
        in_specs=[
            pl.BlockSpec(memory_space=pltpu.MemorySpace.SMEM),   # (1,1) total
            pl.BlockSpec((tile_rows, _LANES), lambda i: (i, 0)),
        ],
        out_specs=pl.BlockSpec((tile_rows, _LANES), lambda i: (i, 0)),
        compiler_params=pltpu.CompilerParams(
            dimension_semantics=("parallel",)),
        cost_estimate=pl.CostEstimate(
            flops=n_pad,
            transcendentals=n_pad,
            bytes_accessed=2 * n_pad * itemsize),
    )(total, slab)

    out = out_slab.reshape(-1)
    if n_pad != n:
        out = out[:n]
    return out.reshape(orig_shape)


if __name__ == "__main__":
    key = jax.random.PRNGKey(0)
    # NCHW-style input consistent with a generic forward pass.
    x = jax.random.normal(key, (2, 4, 16, 16), dtype=jnp.float32)

    y = global_softmax(x)
    y = jax.block_until_ready(y)

    # Reference check (plain JAX, same un-stabilized global-softmax semantics).
    ref = jnp.exp(x) / jnp.sum(jnp.exp(x))
    assert y.shape == x.shape and y.dtype == x.dtype
    assert jnp.allclose(y, ref, atol=1e-6, rtol=1e-6)
    # Global softmax sums to 1 over the whole tensor.
    assert jnp.allclose(jnp.sum(y), 1.0, atol=1e-5)

    print("KERNEL_OK")
</pallas_src>

<mosaic_0001>
module attributes {stable_mosaic.version = 11 : i64} {
  func.func @kernel(%arg0: i32, %arg1: memref<16x128xf32, #tpu.memory_space<vmem>>, %arg2: memref<1x1xf32, #tpu.memory_space<vmem>>) attributes {dimension_semantics = [#tpu.dimension_semantics<arbitrary>], iteration_bounds = array<i64: 1>, scalar_prefetch = 0 : i64, scratch_operands = 0 : i64, tpu.core_type = #tpu.core_type<tc>, window_params = [{transform_indices = @transform_0, window_bounds = array<i64: 16, 128>}, {pipeline_mode = #tpu.pipeline_mode<synchronous>, transform_indices = @transform_1, window_bounds = array<i64: 1, 1>}]} {
    %c0_i32 = arith.constant 0 : i32
    %0 = arith.cmpi eq, %arg0, %c0_i32 : i32
    %1 = arith.extui %0 : i1 to i32
    %c0_i32_0 = arith.constant 0 : i32
    %2 = arith.cmpi ne, %1, %c0_i32_0 : i32
    scf.if %2 {
      %cst_6 = arith.constant 0.000000e+00 : f32
      %13 = vector.broadcast %cst_6 : f32 to vector<1x1xf32>
      %c0_7 = arith.constant 0 : index
      %c0_8 = arith.constant 0 : index
      %14 = vector.load %arg2[%c0_7, %c0_8] : memref<1x1xf32, #tpu.memory_space<vmem>>, vector<1x1xf32>
      tpu.vector_store %arg2[%c0_7, %c0_8], %13 {strides = array<i32>} : memref<1x1xf32, #tpu.memory_space<vmem>>, vector<1x1xf32>,
    } else {
    }
    %c0 = arith.constant 0 : index
    %c0_1 = arith.constant 0 : index
    %3 = vector.load %arg1[%c0, %c0_1] : memref<16x128xf32, #tpu.memory_space<vmem>>, vector<16x128xf32>
    %c0_2 = arith.constant 0 : index
    %c0_3 = arith.constant 0 : index
    %4 = vector.load %arg2[%c0_2, %c0_3] : memref<1x1xf32, #tpu.memory_space<vmem>>, vector<1x1xf32>
    %5 = math.exp %3 : vector<16x128xf32>
    %6 = vector.shape_cast %5 : vector<16x128xf32> to vector<1x16x128xf32>
    %cst = arith.constant dense<0.000000e+00> : vector<1xf32>
    %7 = vector.multi_reduction <add>, %6, %cst [1, 2] : vector<1x16x128xf32> to vector<1xf32>
    %8 = vector.shape_cast %7 : vector<1xf32> to vector<1x1x1xf32>
    %9 = vector.extract %8[0, 0, 0] : f32 from vector<1x1x1xf32>
    %10 = vector.broadcast %9 : f32 to vector<1x1xf32>
    %11 = arith.addf %4, %10 : vector<1x1xf32>
    %c0_4 = arith.constant 0 : index
    %c0_5 = arith.constant 0 : index
    %12 = vector.load %arg2[%c0_4, %c0_5] : memref<1x1xf32, #tpu.memory_space<vmem>>, vector<1x1xf32>
    tpu.vector_store %arg2[%c0_4, %c0_5], %11 {strides = array<i32>} : memref<1x1xf32, #tpu.memory_space<vmem>>, vector<1x1xf32>,
    return
  }
  func.func @transform_0(%arg0: i32) -> (i32, i32) {
    %c0_i32 = arith.constant 0 : i32
    %c0_i32_0 = arith.constant 0 : i32
    return %arg0, %c0_i32 : i32, i32
  }
  func.func @transform_1(%arg0: i32) -> (i32, i32) {
    %c0_i32 = arith.constant 0 : i32
    %c0_i32_0 = arith.constant 0 : i32
    %c0_i32_1 = arith.constant 0 : i32
    return %c0_i32, %c0_i32_0 : i32, i32
  }
}

</mosaic_0001>

<bundles_post_ra>
// kernel: tpu_custom_call.1
= control target key start
LH: loop header
LB: loop body
LE: loop exit
PB: predicated region body
PF: predicated region fallthrough
CT: control target
= control target key end

     0   :  { %6 = vsyncpa [#allocation3], 0  ;;  %s165_s0 = inlined_call_operand.hbm [shape: f32[16,128], index: 0, kind: input, shape index: {}]   ;;  %s166_s1 = inlined_call_operand.hbm [shape: f32[1,1], index: 1, kind: output, shape index: {}]  }
   0x1   :  { %7 = vsyncpa [#allocation4], 0  ;;  %s124_s6 = smov [#allocation2]   ;;  %s76_s10 = scalar_lea.hbm %s165_s0, 256 }
   0x2   :  { %s13_s7 = sshll.u32 %s124_s6, 4  ;;  %p77_p0 = scmp.ne.s32.totalorder %s165_s0, %s76_s10  ;;  %s14_s7 = int_to_ptr.vmem [resolvable:$true] %s13_s7 }
   0x3   :  { %p80_p1 = scmp.lt.u32.totalorder %s76_s10, %s165_s0 }
   0x5   :  { %p82_p2 = pnand %p80_p1, %p77_p0 }
   0x7   :  { %85 = shalt.err (!%p82_p2)
}
   0x8   :  { %s86_s15 = scalar_lea.vmem %s14_s7, 256  ;;  %p91_p4 = scmp.lt.s32.totalorder %s14_s7, %s14_s7 }
   0x9   :  { %p87_p3 = scmp.ne.s32.totalorder %s14_s7, %s86_s15  ;;  %p92_p5 = scmp.lt.s32.totalorder %s86_s15, %s86_s15 }
   0xb   :  { %p93_p6 = por %p92_p5, %p91_p4 }
   0xd   :  { %p94_p7 = pnand %p93_p6, %p87_p3 }
   0xf   :  { %97 = shalt.err (!%p94_p7)
}
  0x10   :  { %s125_s16 = smov 128   ;;  %s126_s17 = smov 8  }
  0x11   :  { %19 = dma.hbm_to_vmem [thread:$0]  %s165_s0, 256, %s14_s7, [#allocation3], %s125_s16, %s125_s16, %s126_s17  }
  0x12   :  { %120 = dma.done.wait [#allocation3], 256  }
  0x13   :  { %121 = vsyncadd [#allocation3], 4294967040  ;;  %vm27_vm0 = vcmask 0   ;;  %v127_v0 = vmov 0.0   ;;  %v29_v1 = vld [vmem:[#allocation2] sm:$0xff]  ;;  %v30_v2 = vld [vmem:[#allocation2 + $0x8] sm:$0xff] }
  0x14   :  { %28 = vst.msk [vmem:[#allocation5] sm:$0x1] %vm27_vm0, %v127_v0  ;;  %v32_v3 = vmul.f32 1.442695, %v29_v1  ;;  %v34_v4 = vmul.f32 1.442695, %v30_v2 }
  0x15   :  { %s128_s0 = smov [#allocation5]  }
  0x16   :  { %72 = vpow2.f32 %v32_v3  ;;  %s56_s20 = sshll.u32 %s128_s0, 4  ;;  %s57_s20 = int_to_ptr.vmem [resolvable:$true] %s56_s20 }
  0x17   :  { %74 = vpow2.f32 %v34_v4  ;;  %s98_s22 = scalar_lea.vmem %s57_s20, 16  ;;  %s102_s23 = scalar_lea.vmem %s57_s20, 32 }
  0x18   :  { %p99_p8 = scmp.ne.s32.totalorder %s57_s20, %s98_s22  ;;  %p103_p9 = scmp.lt.s32.totalorder %s57_s20, %s57_s20 }
  0x19   :  { %p104_p10 = scmp.lt.s32.totalorder %s102_s23, %s98_s22 }
  0x1b   :  { %v31_v15 = vld [vmem:[#allocation5] sm:$0x1]  ;;  %p105_p11 = por %p104_p10, %p103_p9 }
  0x1d   :  { %p106_p12 = pnand %p105_p11, %p99_p8 }
  0x20   :  { %v73_v5 = vpop.eup %72 }
  0x21   :  { %v75_v6 = vpop.eup %74 }
  0x22   :  { %v36_v7 = vadd.f32 %v75_v6, %v73_v5 }
  0x24   :  { %37 = vadd.xlane.f32.xlu0 %v36_v7 }
  0xb1   :  { %v38_v8 = vpop.xlane.xlu0 %37 }
  0xb2   :  { %v39_v9 = vrot.slane %v38_v8, 4 }
  0xb4   :  { %v40_v10 = vadd.f32 %v39_v9, %v38_v8 }
  0xb6   :  { %v41_v11 = vrot.slane %v40_v10, 2 }
  0xb8   :  { %v42_v12 = vadd.f32 %v41_v11, %v40_v10 }
  0xba   :  { %v43_v13 = vrot.slane %v42_v12, 1 }
  0xbc   :  { %v44_v14 = vadd.f32 %v43_v13, %v42_v12 }
  0xbe   :  { %65 = vpush %v44_v14 }
  0xef   :  { %s66_s21 = spop %65 }
  0xf0   :  { %v46_v16 = vstv %s66_s21 }
  0xf1   :  { %v47_v17 = vadd.f32 %v46_v16, %v31_v15 }
  0xf3   :  { %49 = vst.msk [vmem:[#allocation5] sm:$0x1] %vm27_vm0, %v47_v17 }
  0xf4   :  { %109 = shalt.err (!%p106_p12)
}
  0xf5   :  { %s110_s26 = scalar_lea.hbm %s166_s1, 16 }
  0xf6   :  { %p111_p13 = scmp.ne.s32.totalorder %s166_s1, %s110_s26  ;;  %p114_p0 = scmp.lt.u32.totalorder %s110_s26, %s166_s1 }
  0xf8   :  { %p116_p1 = pnand %p114_p0, %p111_p13 }
  0xfa   :  { %119 = shalt.err (!%p116_p1)
}
  0xfb   :  { %59 = dma.vmem_to_hbm [thread:$0]  %s57_s20, 16, %s166_s1, [#allocation4]  }
  0xfc   :  { %122 = dma.done.wait [#allocation4], 16  }
  0xfd   :  { %123 = vsyncadd [#allocation4], 4294967280 }
  0xfe   :  { %63 = vsyncpa [#allocation3], 1 }
  0xff   :  { %64 = vsyncpa [#allocation4], 1 }

</bundles_post_ra>
